<compile_context>
chip_gen: v5e
topology: v5e:2x2
jax: 0.10.0
libtpu: 0.0.40
codegen_flags: <defaults>
</compile_context>

<pallas_src>
import functools

import jax
import jax.numpy as jnp
from jax.experimental import pallas as pl
from jax.experimental.pallas import tpu as pltpu


def _conv_relu_kernel(x_ref, w_ref, b_ref, o_ref, patch_ref, *,
                      nb, c_in, c_out, h, w, ksize):
    """One grid step = `nb` images.

    x_ref:     (nb, c_in, H*W)       row-flattened images (no padding anywhere)
    w_ref:     (c_out, K*K*c_in)     flattened weights, col = (kh*K + kw)*c_in + c
    b_ref:     (c_out, 1)            conv bias pre-scaled by 0.5 (folds the module's *2 / /2)
    o_ref:     (nb, c_out, H*W)      full-height/width conv rows; positions outside the valid
                                     Ho x Wo window are garbage (dropped in the wrapper slice)
    patch_ref: (K*K*c_in, nb*H*W)    VMEM im2col staging scratch (lane-aligned)
    """
    p = h * w

    wt = w_ref[...]          # (c_out, K*K*c_in) -- loaded once, stays in vregs
    bh = b_ref[...]          # (c_out, 1), broadcasts over lanes

    # ---- stage im2col taps into the aligned scratch (plain stores, no concat) ----
    for j in range(nb):
        xj = x_ref[j]                                   # (c_in, H*W)
        base = j * p
        for kh in range(ksize):
            for kw in range(ksize):
                t = kh * ksize + kw
                off = kh * w + kw
                # Shifted tap: scratch[t-th c_in rows, base + q] = x[c, q + off].
                # Every *valid* output position q satisfies q + off <= H*W - 1, so only the
                # first p-off columns matter and no out-of-bounds read ever happens.
                patch_ref[pl.ds(t * c_in, c_in), pl.ds(base, p - off)] = xj[:, off:]
                if off:
                    # Keep the never-needed tail deterministic/finite (it only feeds output
                    # columns that the wrapper slices away).
                    patch_ref[pl.ds(t * c_in, c_in), pl.ds(base + p - off, off)] = (
                        jnp.zeros((c_in, off), jnp.float32))

    # ---- one weight-stationary MXU matmul for the whole block ----
    acc = jnp.dot(wt, patch_ref[...], preferred_element_type=jnp.float32)  # (c_out, nb*p)
    acc = jnp.maximum(acc + bh, 0.0)                                       # +0.5*bias, ReLU

    # ---- lane-dense, 128-aligned stores: (c_out, 256) per image ----
    for j in range(nb):
        o_ref[j] = acc[:, j * p:(j + 1) * p].astype(o_ref.dtype)


def conv_model_forward(x_nchw, weight_oihw, bias, *, images_per_block=None):
    """Pallas implementation of ConvModel.forward. Inputs/outputs are NCHW (PyTorch)."""
    n, c_in, h, w = x_nchw.shape
    c_out, c_in_w, kh_, kw_ = weight_oihw.shape
    assert c_in == c_in_w and kh_ == kw_
    k = kh_
    ho, wo = h - k + 1, w - k + 1
    p = h * w                      # full-height/full-width output positions per image
    kk = k * k

    if images_per_block is None:
        # Per-block footprint: double-buffered x & out blocks + im2col scratch.  Keep it far
        # below v7x's scoped VMEM (32 MiB of 64 MiB physical) and keep >= 2 grid steps when
        # possible so the "parallel" batch axis can shard across v7x's two TensorCores.
        per_image = (c_in * p + c_out * p) * 4 * 2 + kk * c_in * p * 4
        nb = max(1, min(n, (8 * 1024 * 1024) // max(per_image, 1)))
        if n >= 2:
            nb = min(nb, max(1, n // 2))
        while n % nb:
            nb -= 1
        images_per_block = nb
    nb = images_per_block
    assert n % nb == 0

    # Layout plumbing only: free contiguous reshape -- NO jnp.pad, NO activation transposes.
    x_flat = x_nchw.reshape(n, c_in, p).astype(jnp.float32)
    # Parameter prep (tiny): (O,I,KH,KW) -> (O, KH*KW*I); fold the module's *2 and /2 into bias.
    w_t = jnp.transpose(weight_oihw, (0, 2, 3, 1)).reshape(c_out, kk * c_in).astype(jnp.float32)
    b_half = (bias.astype(jnp.float32) * 0.5).reshape(c_out, 1)
    # TODO(synk): optionally cast x_flat / w_t to bfloat16 on v6e/v7x (single-pass MXU, half the
    # input DMA bytes); kept f32 here to preserve the 1e-4 tolerance vs. the reference.

    kernel = functools.partial(
        _conv_relu_kernel, nb=nb, c_in=c_in, c_out=c_out, h=h, w=w, ksize=k)

    cost = pl.CostEstimate(
        flops=2 * n * c_out * kk * c_in * ho * wo,
        transcendentals=0,
        bytes_accessed=(x_flat.size + w_t.size + b_half.size + n * c_out * p) * 4,
    )

    out_flat = pl.pallas_call(
        kernel,
        out_shape=jax.ShapeDtypeStruct((n, c_out, p), jnp.float32),
        grid=(n // nb,),
        in_specs=[
            pl.BlockSpec((nb, c_in, p), lambda i: (i, 0, 0)),
            pl.BlockSpec((c_out, kk * c_in), lambda i: (0, 0)),
            pl.BlockSpec((c_out, 1), lambda i: (0, 0)),
        ],
        out_specs=pl.BlockSpec((nb, c_out, p), lambda i: (i, 0, 0)),
        scratch_shapes=[pltpu.VMEM((kk * c_in, nb * p), jnp.float32)],
        compiler_params=pltpu.CompilerParams(
            dimension_semantics=("parallel",),
            vmem_limit_bytes=32 * 1024 * 1024,
        ),
        cost_estimate=cost,
    )(x_flat, w_t, b_half)

    # (N, C_out, H*W) -> (N, C_out, H, W) is a free contiguous reshape; a single slice drops
    # the garbage bottom rows / right columns (valid window is Ho x Wo).
    return out_flat.reshape(n, c_out, h, w)[:, :, :ho, :wo]


def _reference_forward(x_nchw, weight_oihw, bias):
    """Pure-JAX reference matching the PyTorch module exactly."""
    y = jax.lax.conv_general_dilated(
        x_nchw * 2.0,
        weight_oihw,
        window_strides=(1, 1),
        padding="VALID",
        dimension_numbers=("NCHW", "OIHW", "NCHW"),
        precision=jax.lax.Precision.HIGHEST,
    )
    y = y + bias[None, :, None, None]
    y = y / 2.0
    return jnp.maximum(y, 0.0)


if __name__ == "__main__":
    # Small shapes consistent with the module: ConvModel(c_in=4, c_out=8), 16x16 input.
    N, C_IN, C_OUT, H, W, K = 2, 4, 8, 16, 16, 3

    key = jax.random.PRNGKey(0)
    kx, kw_, kb = jax.random.split(key, 3)

    x = jax.random.normal(kx, (N, C_IN, H, W), dtype=jnp.float32)

    # Deterministic parameter init (PyTorch Conv2d default: U(-1/sqrt(fan_in), 1/sqrt(fan_in)))
    fan_in = C_IN * K * K
    bound = 1.0 / (fan_in ** 0.5)
    weight = jax.random.uniform(kw_, (C_OUT, C_IN, K, K), jnp.float32, -bound, bound)
    bias = jax.random.uniform(kb, (C_OUT,), jnp.float32, -bound, bound)

    out = jax.block_until_ready(conv_model_forward(x, weight, bias))
    ref = jax.block_until_ready(_reference_forward(x, weight, bias))

    assert out.shape == (N, C_OUT, H - K + 1, W - K + 1), out.shape
    assert jnp.allclose(out, ref, rtol=1e-4, atol=1e-4), float(jnp.max(jnp.abs(out - ref)))

    print("KERNEL_OK")
</pallas_src>

<mosaic_0001>
module attributes {stable_mosaic.version = 11 : i64} {
  func.func @_conv_relu_kernel(%arg0: i32, %arg1: memref<1x4x256xf32, #tpu.memory_space<vmem>>, %arg2: memref<8x36xf32, #tpu.memory_space<vmem>>, %arg3: memref<8x1xf32, #tpu.memory_space<vmem>>, %arg4: memref<1x8x256xf32, #tpu.memory_space<vmem>>, %arg5: memref<36x256xf32, #tpu.memory_space<vmem>>) attributes {dimension_semantics = [#tpu.dimension_semantics<parallel>], iteration_bounds = array<i64: 2>, scalar_prefetch = 0 : i64, scratch_operands = 1 : i64, tpu.core_type = #tpu.core_type<tc>, window_params = [{transform_indices = @transform_0, window_bounds = array<i64: 1, 4, 256>}, {pipeline_mode = #tpu.pipeline_mode<synchronous>, transform_indices = @transform_1, window_bounds = array<i64: 8, 36>}, {pipeline_mode = #tpu.pipeline_mode<synchronous>, transform_indices = @transform_2, window_bounds = array<i64: 8, 1>}, {transform_indices = @transform_3, window_bounds = array<i64: 1, 8, 256>}]} {
    %c0 = arith.constant 0 : index
    %c0_0 = arith.constant 0 : index
    %0 = vector.load %arg2[%c0, %c0_0] : memref<8x36xf32, #tpu.memory_space<vmem>>, vector<8x36xf32>
    %c0_1 = arith.constant 0 : index
    %c0_2 = arith.constant 0 : index
    %1 = vector.load %arg3[%c0_1, %c0_2] : memref<8x1xf32, #tpu.memory_space<vmem>>, vector<8x1xf32>
    %c0_3 = arith.constant 0 : index
    %c0_4 = arith.constant 0 : index
    %c0_5 = arith.constant 0 : index
    %2 = vector.load %arg1[%c0_3, %c0_4, %c0_5] : memref<1x4x256xf32, #tpu.memory_space<vmem>>, vector<1x4x256xf32>
    %3 = vector.shape_cast %2 : vector<1x4x256xf32> to vector<4x256xf32>
    %c0_6 = arith.constant 0 : index
    %c0_7 = arith.constant 0 : index
    %4 = vector.load %arg5[%c0_6, %c0_7] : memref<36x256xf32, #tpu.memory_space<vmem>>, vector<4x256xf32>
    tpu.vector_store %arg5[%c0_6, %c0_7], %3 {strides = array<i32>} : memref<36x256xf32, #tpu.memory_space<vmem>>, vector<4x256xf32>,
    %5 = vector.extract_strided_slice %3 {offsets = [0, 1], sizes = [4, 255], strides = [1, 1]} : vector<4x256xf32> to vector<4x255xf32>
    %c4 = arith.constant 4 : index
    %c0_8 = arith.constant 0 : index
    %6 = vector.load %arg5[%c4, %c0_8] : memref<36x256xf32, #tpu.memory_space<vmem>>, vector<4x255xf32>
    tpu.vector_store %arg5[%c4, %c0_8], %5 {strides = array<i32>} : memref<36x256xf32, #tpu.memory_space<vmem>>, vector<4x255xf32>,
    %cst = arith.constant 0.000000e+00 : f32
    %7 = vector.broadcast %cst : f32 to vector<4x1xf32>
    %c4_9 = arith.constant 4 : index
    %c255 = arith.constant 255 : index
    %8 = vector.load %arg5[%c4_9, %c255] : memref<36x256xf32, #tpu.memory_space<vmem>>, vector<4x1xf32>
    tpu.vector_store %arg5[%c4_9, %c255], %7 {strides = array<i32>} : memref<36x256xf32, #tpu.memory_space<vmem>>, vector<4x1xf32>,
    %9 = vector.extract_strided_slice %3 {offsets = [0, 2], sizes = [4, 254], strides = [1, 1]} : vector<4x256xf32> to vector<4x254xf32>
    %c8 = arith.constant 8 : index
    %c0_10 = arith.constant 0 : index
    %10 = vector.load %arg5[%c8, %c0_10] : memref<36x256xf32, #tpu.memory_space<vmem>>, vector<4x254xf32>
    tpu.vector_store %arg5[%c8, %c0_10], %9 {strides = array<i32>} : memref<36x256xf32, #tpu.memory_space<vmem>>, vector<4x254xf32>,
    %cst_11 = arith.constant 0.000000e+00 : f32
    %11 = vector.broadcast %cst_11 : f32 to vector<4x2xf32>
    %c8_12 = arith.constant 8 : index
    %c254 = arith.constant 254 : index
    %12 = vector.load %arg5[%c8_12, %c254] : memref<36x256xf32, #tpu.memory_space<vmem>>, vector<4x2xf32>
    tpu.vector_store %arg5[%c8_12, %c254], %11 {strides = array<i32>} : memref<36x256xf32, #tpu.memory_space<vmem>>, vector<4x2xf32>,
    %13 = vector.extract_strided_slice %3 {offsets = [0, 16], sizes = [4, 240], strides = [1, 1]} : vector<4x256xf32> to vector<4x240xf32>
    %c12 = arith.constant 12 : index
    %c0_13 = arith.constant 0 : index
    %14 = vector.load %arg5[%c12, %c0_13] : memref<36x256xf32, #tpu.memory_space<vmem>>, vector<4x240xf32>
    tpu.vector_store %arg5[%c12, %c0_13], %13 {strides = array<i32>} : memref<36x256xf32, #tpu.memory_space<vmem>>, vector<4x240xf32>,
    %cst_14 = arith.constant 0.000000e+00 : f32
    %15 = vector.broadcast %cst_14 : f32 to vector<4x16xf32>
    %c12_15 = arith.constant 12 : index
    %c240 = arith.constant 240 : index
    %16 = vector.load %arg5[%c12_15, %c240] : memref<36x256xf32, #tpu.memory_space<vmem>>, vector<4x16xf32>
    tpu.vector_store %arg5[%c12_15, %c240], %15 {strides = array<i32>} : memref<36x256xf32, #tpu.memory_space<vmem>>, vector<4x16xf32>,
    %17 = vector.extract_strided_slice %3 {offsets = [0, 17], sizes = [4, 239], strides = [1, 1]} : vector<4x256xf32> to vector<4x239xf32>
    %c16 = arith.constant 16 : index
    %c0_16 = arith.constant 0 : index
    %18 = vector.load %arg5[%c16, %c0_16] : memref<36x256xf32, #tpu.memory_space<vmem>>, vector<4x239xf32>
    tpu.vector_store %arg5[%c16, %c0_16], %17 {strides = array<i32>} : memref<36x256xf32, #tpu.memory_space<vmem>>, vector<4x239xf32>,
    %cst_17 = arith.constant 0.000000e+00 : f32
    %19 = vector.broadcast %cst_17 : f32 to vector<4x17xf32>
    %c16_18 = arith.constant 16 : index
    %c239 = arith.constant 239 : index
    %20 = vector.load %arg5[%c16_18, %c239] : memref<36x256xf32, #tpu.memory_space<vmem>>, vector<4x17xf32>
    tpu.vector_store %arg5[%c16_18, %c239], %19 {strides = array<i32>} : memref<36x256xf32, #tpu.memory_space<vmem>>, vector<4x17xf32>,
    %21 = vector.extract_strided_slice %3 {offsets = [0, 18], sizes = [4, 238], strides = [1, 1]} : vector<4x256xf32> to vector<4x238xf32>
    %c20 = arith.constant 20 : index
    %c0_19 = arith.constant 0 : index
    %22 = vector.load %arg5[%c20, %c0_19] : memref<36x256xf32, #tpu.memory_space<vmem>>, vector<4x238xf32>
    tpu.vector_store %arg5[%c20, %c0_19], %21 {strides = array<i32>} : memref<36x256xf32, #tpu.memory_space<vmem>>, vector<4x238xf32>,
    %cst_20 = arith.constant 0.000000e+00 : f32
    %23 = vector.broadcast %cst_20 : f32 to vector<4x18xf32>
    %c20_21 = arith.constant 20 : index
    %c238 = arith.constant 238 : index
    %24 = vector.load %arg5[%c20_21, %c238] : memref<36x256xf32, #tpu.memory_space<vmem>>, vector<4x18xf32>
    tpu.vector_store %arg5[%c20_21, %c238], %23 {strides = array<i32>} : memref<36x256xf32, #tpu.memory_space<vmem>>, vector<4x18xf32>,
    %25 = vector.extract_strided_slice %3 {offsets = [0, 32], sizes = [4, 224], strides = [1, 1]} : vector<4x256xf32> to vector<4x224xf32>
    %c24 = arith.constant 24 : index
    %c0_22 = arith.constant 0 : index
    %26 = vector.load %arg5[%c24, %c0_22] : memref<36x256xf32, #tpu.memory_space<vmem>>, vector<4x224xf32>
    tpu.vector_store %arg5[%c24, %c0_22], %25 {strides = array<i32>} : memref<36x256xf32, #tpu.memory_space<vmem>>, vector<4x224xf32>,
    %cst_23 = arith.constant 0.000000e+00 : f32
    %27 = vector.broadcast %cst_23 : f32 to vector<4x32xf32>
    %c24_24 = arith.constant 24 : index
    %c224 = arith.constant 224 : index
    %28 = vector.load %arg5[%c24_24, %c224] : memref<36x256xf32, #tpu.memory_space<vmem>>, vector<4x32xf32>
    tpu.vector_store %arg5[%c24_24, %c224], %27 {strides = array<i32>} : memref<36x256xf32, #tpu.memory_space<vmem>>, vector<4x32xf32>,
    %29 = vector.extract_strided_slice %3 {offsets = [0, 33], sizes = [4, 223], strides = [1, 1]} : vector<4x256xf32> to vector<4x223xf32>
    %c28 = arith.constant 28 : index
    %c0_25 = arith.constant 0 : index
    %30 = vector.load %arg5[%c28, %c0_25] : memref<36x256xf32, #tpu.memory_space<vmem>>, vector<4x223xf32>
    tpu.vector_store %arg5[%c28, %c0_25], %29 {strides = array<i32>} : memref<36x256xf32, #tpu.memory_space<vmem>>, vector<4x223xf32>,
    %cst_26 = arith.constant 0.000000e+00 : f32
    %31 = vector.broadcast %cst_26 : f32 to vector<4x33xf32>
    %c28_27 = arith.constant 28 : index
    %c223 = arith.constant 223 : index
    %32 = vector.load %arg5[%c28_27, %c223] : memref<36x256xf32, #tpu.memory_space<vmem>>, vector<4x33xf32>
    tpu.vector_store %arg5[%c28_27, %c223], %31 {strides = array<i32>} : memref<36x256xf32, #tpu.memory_space<vmem>>, vector<4x33xf32>,
    %33 = vector.extract_strided_slice %3 {offsets = [0, 34], sizes = [4, 222], strides = [1, 1]} : vector<4x256xf32> to vector<4x222xf32>
    %c32 = arith.constant 32 : index
    %c0_28 = arith.constant 0 : index
    %34 = vector.load %arg5[%c32, %c0_28] : memref<36x256xf32, #tpu.memory_space<vmem>>, vector<4x222xf32>
    tpu.vector_store %arg5[%c32, %c0_28], %33 {strides = array<i32>} : memref<36x256xf32, #tpu.memory_space<vmem>>, vector<4x222xf32>,
    %cst_29 = arith.constant 0.000000e+00 : f32
    %35 = vector.broadcast %cst_29 : f32 to vector<4x34xf32>
    %c32_30 = arith.constant 32 : index
    %c222 = arith.constant 222 : index
    %36 = vector.load %arg5[%c32_30, %c222] : memref<36x256xf32, #tpu.memory_space<vmem>>, vector<4x34xf32>
    tpu.vector_store %arg5[%c32_30, %c222], %35 {strides = array<i32>} : memref<36x256xf32, #tpu.memory_space<vmem>>, vector<4x34xf32>,
    %c0_31 = arith.constant 0 : index
    %c0_32 = arith.constant 0 : index
    %37 = vector.load %arg5[%c0_31, %c0_32] : memref<36x256xf32, #tpu.memory_space<vmem>>, vector<36x256xf32>
    %cst_33 = arith.constant dense<0.000000e+00> : vector<8x256xf32>
    %38 = tpu.matmul %0, %37, %cst_33 {dimension_numbers = #tpu.dot_dimension_numbers<[1], [0], [0], [1], [0, 0, 1, 1], [], []>} : vector<8x36xf32>, vector<36x256xf32>, vector<8x256xf32> -> vector<8x256xf32>
    %39 = vector.broadcast %1 : vector<8x1xf32> to vector<8x256xf32>
    %40 = arith.addf %38, %39 : vector<8x256xf32>
    %cst_34 = arith.constant 0.000000e+00 : f32
    %41 = vector.broadcast %cst_34 : f32 to vector<8x256xf32>
    %42 = arith.maximumf %40, %41 : vector<8x256xf32>
    %c0_35 = arith.constant 0 : index
    %c0_36 = arith.constant 0 : index
    %c0_37 = arith.constant 0 : index
    %43 = vector.load %arg4[%c0_35, %c0_36, %c0_37] : memref<1x8x256xf32, #tpu.memory_space<vmem>>, vector<1x8x256xf32>
    %44 = vector.shape_cast %43 : vector<1x8x256xf32> to vector<8x256xf32>
    %45 = vector.shape_cast %42 : vector<8x256xf32> to vector<1x8x256xf32>
    tpu.vector_store %arg4[%c0_35, %c0_36, %c0_37], %45 {strides = array<i32>} : memref<1x8x256xf32, #tpu.memory_space<vmem>>, vector<1x8x256xf32>,
    return
  }
  func.func @transform_0(%arg0: i32) -> (i32, i32, i32) {
    %c0_i32 = arith.constant 0 : i32
    %c0_i32_0 = arith.constant 0 : i32
    %c0_i32_1 = arith.constant 0 : i32
    return %arg0, %c0_i32, %c0_i32_0 : i32, i32, i32
  }
  func.func @transform_1(%arg0: i32) -> (i32, i32) {
    %c0_i32 = arith.constant 0 : i32
    %c0_i32_0 = arith.constant 0 : i32
    %c0_i32_1 = arith.constant 0 : i32
    return %c0_i32, %c0_i32_0 : i32, i32
  }
  func.func @transform_2(%arg0: i32) -> (i32, i32) {
    %c0_i32 = arith.constant 0 : i32
    %c0_i32_0 = arith.constant 0 : i32
    %c0_i32_1 = arith.constant 0 : i32
    return %c0_i32, %c0_i32_0 : i32, i32
  }
  func.func @transform_3(%arg0: i32) -> (i32, i32, i32) {
    %c0_i32 = arith.constant 0 : i32
    %c0_i32_0 = arith.constant 0 : i32
    %c0_i32_1 = arith.constant 0 : i32
    return %arg0, %c0_i32, %c0_i32_0 : i32, i32, i32
  }
}

</mosaic_0001>

<bundles_post_ra>
// kernel: tpu_custom_call.1
= control target key start
LH: loop header
LB: loop body
LE: loop exit
PB: predicated region body
PF: predicated region fallthrough
CT: control target
= control target key end

     0   :  { %8 = vsyncpa [#allocation4], 0  ;;  %s837_s0 = inlined_call_operand.hbm [shape: f32[2,4,256], index: 0, kind: input, shape index: {}]   ;;  %s838_s1 = inlined_call_operand.vmem [shape: f32[8,36], index: 1, kind: input, shape index: {}]   ;;  %s839_s2 = inlined_call_operand.vmem [shape: f32[8,1], index: 2, kind: input, shape index: {}]   ;;  %s840_s3 = inlined_call_operand.hbm [shape: f32[2,8,256], index: 3, kind: output, shape index: {}]  }
   0x1   :  { %10 = vsyncpa [#allocation4 + $0x1], 0 }
   0x2   :  { %11 = vsyncpa [#allocation5], 0 }
   0x3   :  { %13 = vsyncpa [#allocation5 + $0x1], 0  ;;  %s695_s12 = smov 0   ;;  %s697_s13 = smov 0  }
   0x4   :  { %s699_s14 = smov 0   ;;  %s701_s15 = smov 0  }
   0x5 LB: > { %s716_s16 = sadd.s32 4294967295, %s663_s15   ;;  %s489_s17 = sadd.s32 4294967294, %s663_s15   ;;  %s663_s15 = sphi %s701_s15, %s850_s15   ;;  %s659_s14 = sphi %s699_s14, %s849_s14   ;;  %s655_s13 = sphi %s697_s13, %s848_s13   ;;  %s651_s12 = sphi %s695_s12, %s847_s12  }
   0x6   : > { %s720_s18 = sadd.s32 1, %s663_s15   ;;  %s26_s19 = sadd.s32 1, %s659_s14 }
   0x7   : > { %s23_s20 = ssub.s32 %s663_s15, %s720_s18  ;;  %p33_p0 = scmp.ne.s32.totalorder %s659_s14, %s655_s13 }
   0x8   : > { %p24_p1 = scmp.eq.s32.totalorder %s23_s20, 0  ;;  %p34_p2 = scmp.eq.s32.totalorder %s663_s15, 0 }
   0x9   : > { %p39_p3 = scmp.ne.s32.totalorder %s655_s13, %s651_s12  ;;  %p40_p4 = scmp.eq.s32.totalorder %s716_s16, 0 }
   0xa   : > { %s732_s21 = scalar_select %p24_p1, %s659_s14, %s26_s19  }
   0xb   : > { %p734_p5 = por %p34_p2, %p33_p0  ;;  %p738_p6 = por %p40_p4, %p39_p3 }
   0xc   : > { %p105_p7 = scmp.eq.s32.totalorder %s716_s16, 1  ;;  %p111_p8 = scmp.eq.s32.totalorder %s489_s17, 1 }
   0xd   : > { %p521_p10 = scmp.lt.s32.totalorder %s663_s15, 2  ;;  %s137_s26 = sand.u32 1, %s659_s14  }
   0xe   : > { %p745_p11 = por %p105_p7, %p33_p0  ;;  %p749_p12 = por %p111_p8, %p39_p3 }
   0xf   : > { %s507_s27 = sshll.u32 %s663_s15, 3  ;;  %s492_s28 = sshll.u32 %s137_s26, 3 }
  0x10   : > { %s146_s4 = scalar_lea.hbm %s837_s0, %s507_s27  ;;  %s141_s6 = scalar_lea.vmem [#allocation3], %s492_s28 }
  0x11   : > { %s148_s5 = sshll.u32 %s146_s4, 4  ;;  %s150_s7 = sshll.u32 %s141_s6, 4  ;;  %s149_s5 = int_to_ptr.hbm [resolvable:$true] %s148_s5  ;;  %s151_s7 = int_to_ptr.vmem [resolvable:$true] %s150_s7 }
  0x12   : > { %p760_p13 = pnand %p521_p10, %p734_p5  ;;  %p495_p0 = scmp.ge.s32.totalorder %s663_s15, 1 }
  0x13   : > { %p155_p1 = scmp.lt.s32.totalorder %s663_s15, 3  ;;  %s138_s9 = scalar_lea.sflag [#allocation4], %s137_s26 }
  0x14   : > { %s567_s10 = sshra.s32 %s149_s5, 4  ;;  %p571_p3 = pneg %p760_p13  ;;  %s568_s10 = int_to_ptr.hbm [resolvable:$true] %s567_s10 }
  0x15   : > { %s569_s11 = scalar_lea.hbm %s568_s10, 8  ;;  %s574_s20 = scalar_lea.hbm %s837_s0, 16 }
  0x16   : > { %p570_p2 = scmp.ne.s32.totalorder %s568_s10, %s569_s11  ;;  %p575_p5 = scmp.lt.s32.totalorder %s568_s10, %s837_s0 }
  0x17   : > { %p576_p8 = scmp.lt.s32.totalorder %s574_s20, %s569_s11 }
  0x18   : > { %p572_p4 = pnand %p571_p3, %p570_p2 }
  0x19   : > { %p577_p10 = por %p576_p8, %p575_p5 }
  0x1a   : > { %p573_p7 = pneg %p572_p4 }
  0x1c   : > { %p578_p9 = pnand %p577_p10, %p573_p7 }
  0x1e   : > { %581 = shalt.err (!%p578_p9)
}
  0x1f   : > { %516 = dma.hbm_to_vmem [thread:$0]  (!%p760_p13), %s149_s5, 128, %s151_s7, %s138_s9  }
  0x20   : > { %p156_p2 = pnand %p495_p0, %p155_p1 }
  0x21   : > { %s781_s26 = sand.u32 (!%p156_p2), 1, %s655_s13  }
  0x22   : > { %159 = sbr.rel (%p156_p2) target bundleno = 388 (0x184), region = 32  ;;  %s496_s28 = sshll.u32 (!%p156_p2), %s781_s26, 3 }
  0x23   : > { %s162_s29 = scalar_lea.sflag (!%p156_p2), [#allocation4], %s781_s26  ;;  %s165_s30 = scalar_lea.vmem (!%p156_p2), [#allocation3], %s496_s28 }
  0x27   : > { %642 = dma.done.wait (%p738_p6), %s162_s29, 128  }
  0x28   : > { %644 = vsyncadd (%p738_p6), %s162_s29, 4294967168  ;;  %v191_v0 = vld [vmem:[%s165_s30] sm:$0xff]  ;;  %s665_s4 = smov 126   ;;  %s666_s23 = smov 112   ;;  %vm229_vm0 = vcmask 1027072   ;;  %vm231_vm1 = vcmask 1044464  }
  0x29   : > { %193 = vst [vmem:[#allocation1] ss:$2 sm:$0xff] %v191_v0  ;;  %s667_s5 = smov 111   ;;  %s668_s6 = smov 110   ;;  %v673_v20 = vmov 0.0   ;;  %vm224_vm2 = vcmask 1031168  }
  0x2a   : > { %s669_s7 = smov 96   ;;  %s670_s8 = smov 95   ;;  %vm262_vm3 = vcmask 904192   ;;  %vm257_vm4 = vcmask 908288   ;;  %vm264_vm5 = vcmask 1044344   ;;  %vm274_vm6 = vcmask 900096  }
  0x2b   : > { %s671_s9 = smov 94   ;;  %s672_s10 = smov 127   ;;  %vm279_vm7 = vcmask 900100   ;;  %vm307_vm8 = vcmask 777216   ;;  %vm281_vm9 = vcmask 1048436   ;;  %vm312_vm10 = vcmask 777220  }
  0x2c   : > { %vm314_vm11 = vcmask 1048316   ;;  %vm290_vm12 = vcmask 785408   ;;  %vm295_vm13 = vcmask 781312   ;;  %vm297_vm14 = vcmask 1044224   ;;  %v190_v36 = vld [vmem:[%s839_s2] sm:$0xff]  ;;  %s497_s22 = sshll.u32 %s781_s26, 4 }
  0x2d   : > { %v674_v37 = vmov 0   ;;  %vm241_vm15 = vcmask 916480   ;;  %v189_v54 = vld [vmem:[%s838_s1] sm:$0xff]  ;;  %s508_s27 = sshll.u32 %s716_s16, 4  ;;  %s403_s16 = scalar_lea.sflag [#allocation5], %s781_s26 }
  0x2e   : > { %565 = vset.pattern.permute.xlu1 %v674_v37  ;;  %566 = vset.pattern.permute.xlu0 %v674_v37  ;;  %s414_s30 = scalar_lea.hbm %s840_s3, %s508_s27 }
  0x30   : > { %v194_v1 = vld.sshfl [vmem:[#allocation1] sm:$0xff pattern:$0x75316420]  ;;  %v195_v2 = vld.sshfl [vmem:[#allocation1 + $0x8] sm:$0xff pattern:$0x75316420] }
  0x31   : > { %201 = vst [vmem:[#allocation1 + $0x1] ss:$2 sm:$0xff] %v191_v0 }
  0x32   : > { %198 = vst [vmem:[#allocation2] sm:$0xf] %v194_v1 }
  0x33   : > { %199 = vst [vmem:[#allocation2 + $0x8] sm:$0xf] %v195_v2 }
  0x38   : > { %v202_v3 = vld.sshfl [vmem:[#allocation1] sm:$0xff pattern:$0x75316420]  ;;  %v203_v4 = vld.sshfl [vmem:[#allocation1 + $0x8] sm:$0xff pattern:$0x75316420] }
  0x39   : > { %217 = vst [vmem:[#allocation1] ss:$2 sm:$0xff] %v191_v0 }
  0x40   : > { %v218_v5 = vld.sshfl [vmem:[#allocation1] sm:$0xff pattern:$0x75316420]  ;;  %v219_v6 = vld.sshfl [vmem:[#allocation1 + $0x8] sm:$0xff pattern:$0x75316420] }
  0x41   : > { %220 = vrot.lane.b32.xlu1 %v218_v5, %s665_s4  ;;  %234 = vst [vmem:[#allocation1 + $0x1] ss:$2 sm:$0xff] %v191_v0  ;;  %222 = vrot.lane.b32.xlu2 %v219_v6, %s665_s4  ;;  %s188_s4 = scalar_lea.vmem [#allocation6], %s497_s22 }
  0x48   : > { %v236_v7 = vld.sshfl [vmem:[#allocation1 + $0x8] sm:$0xff pattern:$0x75316420]  ;;  %v235_v8 = vld.sshfl [vmem:[#allocation1] sm:$0xff pattern:$0x75316420] }
  0x49   : > { %237 = vrot.lane.b32.xlu0 %v235_v8, %s666_s23  ;;  %250 = vst [vmem:[#allocation1] ss:$2 sm:$0xff] %v191_v0 }
  0x50   : > { %v252_v9 = vld.sshfl [vmem:[#allocation1 + $0x8] sm:$0xff pattern:$0x75316420]  ;;  %v251_v10 = vld.sshfl [vmem:[#allocation1] sm:$0xff pattern:$0x75316420] }
  0x51   : > { %255 = vrot.lane.b32.xlu1 %v252_v9, %s667_s5  ;;  %253 = vrot.lane.b32.xlu0 %v251_v10, %s667_s5  ;;  %267 = vst [vmem:[#allocation1 + $0x1] ss:$2 sm:$0xff] %v191_v0  ;;  %s418_s5 = sshll.u32 %s414_s30, 4  ;;  %s419_s5 = int_to_ptr.hbm [resolvable:$true] %s418_s5 }
  0x58   : > { %v269_v11 = vld.sshfl [vmem:[#allocation1 + $0x8] sm:$0xff pattern:$0x75316420]  ;;  %v268_v12 = vld.sshfl [vmem:[#allocation1] sm:$0xff pattern:$0x75316420] }
  0x59   : > { %272 = vrot.lane.b32.xlu0 %v269_v11, %s668_s6  ;;  %283 = vst [vmem:[#allocation1] ss:$2 sm:$0xff] %v191_v0  ;;  %270 = vrot.lane.b32.xlu2 %v268_v12, %s668_s6  ;;  %s611_s6 = sshra.s32 %s419_s5, 4  ;;  %s612_s6 = int_to_ptr.hbm [resolvable:$true] %s611_s6 }
  0x5a   : > { %p618_p0 = scmp.lt.s32.totalorder %s612_s6, %s840_s3 }
  0x60   : > { %v284_v13 = vld.sshfl [vmem:[#allocation1] sm:$0xff pattern:$0x75316420]  ;;  %v285_v14 = vld.sshfl [vmem:[#allocation1 + $0x8] sm:$0xff pattern:$0x75316420] }
  0x61   : > { %286 = vrot.lane.b32.xlu1 %v284_v13, %s669_s7  ;;  %300 = vst [vmem:[#allocation1 + $0x1] ss:$2 sm:$0xff] %v191_v0 }
  0x68   : > { %v301_v15 = vld.sshfl [vmem:[#allocation1] sm:$0xff pattern:$0x75316420]  ;;  %v302_v16 = vld.sshfl [vmem:[#allocation1 + $0x8] sm:$0xff pattern:$0x75316420] }
  0x69   : > { %288 = vrot.lane.b32.xlu1 %v285_v14, %s669_s7  ;;  %316 = vst [vmem:[#allocation1] ss:$2 sm:$0xff] %v191_v0  ;;  %303 = vrot.lane.b32.xlu2 %v301_v15, %s670_s8  ;;  %s613_s7 = scalar_lea.hbm %s612_s6, 16 }
  0x6a   : > { %p614_p6 = scmp.ne.s32.totalorder %s612_s6, %s613_s7 }
  0x6c   : > { %p615_p9 = pnand %p614_p6, %p745_p11 }
  0x6e   : > { %p616_p13 = pneg %p615_p9 }
  0x70   : > { %v317_v17 = vld.sshfl [vmem:[#allocation1] sm:$0xff pattern:$0x75316420]  ;;  %v318_v18 = vld.sshfl [vmem:[#allocation1 + $0x8] sm:$0xff pattern:$0x75316420] }
  0x71   : > { %239 = vrot.lane.b32.xlu1 %v236_v7, %s666_s23  ;;  %319 = vrot.lane.b32.xlu0 %v317_v17, %s671_s9  ;;  %s416_s23 = sshll.u32 %s188_s4, 4  ;;  %s417_s23 = int_to_ptr.vmem [resolvable:$true] %s416_s23 }
  0x72   : > { %305 = vrot.lane.b32.xlu2 %v302_v16, %s670_s8 }
  0x79   : > { %321 = vrot.lane.b32.xlu0 %v318_v18, %s671_s9  ;;  %344 = vperm.xlu1 %565, %v190_v36  }
  0x7a   : > { %204 = vrot.lane.b32.xlu2 %v202_v3, %s672_s10 }
  0x81   : > { %206 = vrot.lane.b32.xlu0 %v203_v4, %s672_s10  ;;  %s617_s10 = scalar_lea.hbm %s840_s3, 32 }
  0x82   : > { %p619_p1 = scmp.lt.s32.totalorder %s617_s10, %s613_s7 }
  0x84   : > { %p620_p3 = por %p619_p1, %p618_p0 }
  0x86   : > { %p621_p4 = pnand %p620_p3, %p616_p13 }
  0x9b   : > { %v223_v19 = vpop.permute.xlu2 %222 }
  0x9c   : > { %230 = vst.msk [vmem:[#allocation2 + $0x18] sm:$0xf] %vm229_vm0, %v223_v19  ;;  %vm246_vm0 = vcmask 916484  }
  0x9d   : > { %232 = vst.msk [vmem:[#allocation2 + $0x18] sm:$0xf] %vm231_vm1, %v673_v20  ;;  %vm248_vm1 = vcmask 1048452  }
  0xb3   : > { %v221_v21 = vpop.permute.xlu1 %220  ;;  %v271_v23 = vpop.permute.xlu2 %270 }
  0xb4   : > { %v225_v22 = vsel %vm224_vm2, %v221_v21, %v223_v19  ;;  %vm323_vm2 = vcmask 769024  }
  0xb5   : > { %228 = vst [vmem:[#allocation2 + $0x10] sm:$0xf] %v225_v22 }
  0xbb   : > { %v238_v24 = vpop.permute.xlu0 %237 }
  0xc3   : > { %v256_v25 = vpop.permute.xlu1 %255  ;;  %v254_v26 = vpop.permute.xlu0 %253 }
  0xc4   : > { %263 = vst.msk [vmem:[#allocation2 + $0x28] sm:$0xf] %vm262_vm3, %v256_v25  ;;  %v258_v27 = vsel %vm257_vm4, %v254_v26, %v256_v25  ;;  %v304_v28 = vpop.permute.xlu2 %303  ;;  %vm328_vm3 = vcmask 764928   ;;  %vm330_vm4 = vcmask 1044208  }
  0xc5   : > { %265 = vst.msk [vmem:[#allocation2 + $0x28] sm:$0xf] %vm264_vm5, %v673_v20  ;;  %vm208_vm5 = vcmask 1039360  }
  0xc6   : > { %261 = vst [vmem:[#allocation2 + $0x20] sm:$0xf] %v258_v27 }
  0xcb   : > { %v273_v29 = vpop.permute.xlu0 %272 }
  0xcc   : > { %v275_v30 = vsel %vm274_vm6, %v271_v23, %v273_v29  ;;  %280 = vst.msk [vmem:[#allocation2 + $0x28] sm:$0xf0] %vm279_vm7, %v273_v29  ;;  %v306_v31 = vpop.permute.xlu2 %305  ;;  %vm213_vm6 = vcmask 1039364   ;;  %vm351_vm7 = vcmask 1043456  }
  0xcd   : > { %278 = vst [vmem:[#allocation2 + $0x20] sm:$0xf0] %v275_v30  ;;  %v308_v32 = vsel %vm307_vm8, %v304_v28, %v306_v31  ;;  %vm215_vm8 = vcmask 1048572  }
  0xce   : > { %282 = vst.msk [vmem:[#allocation2 + $0x28] sm:$0xf0] %vm281_vm9, %v673_v20  ;;  %vm347_vm9 = vcmask 293888  }
  0xcf   : > { %311 = vst [vmem:[#allocation2 + $0x30] sm:$0xf0] %v308_v32 }
  0xd0   : > { %313 = vst.msk [vmem:[#allocation2 + $0x38] sm:$0xf0] %vm312_vm10, %v306_v31 }
  0xd1   : > { %315 = vst.msk [vmem:[#allocation2 + $0x38] sm:$0xf0] %vm314_vm11, %v673_v20 }
  0xd3   : > { %v287_v33 = vpop.permute.xlu1 %286 }
  0xd4   : > { %v205_v43 = vpop.permute.xlu2 %204  ;;  %v336_v51 = vld [vmem:[#allocation2 + $0x20] sm:$0xff] }
  0xd5   : > { %v337_v50 = vld [vmem:[#allocation2 + $0x28] sm:$0xff] }
  0xdb   : > { %v289_v34 = vpop.permute.xlu1 %288 }
  0xdc   : > { %v291_v35 = vsel %vm290_vm12, %v287_v33, %v289_v34  ;;  %296 = vst.msk [vmem:[#allocation2 + $0x38] sm:$0xf] %vm295_vm13, %v289_v34 }
  0xdd   : > { %294 = vst [vmem:[#allocation2 + $0x30] sm:$0xf] %v291_v35 }
  0xde   : > { %298 = vst.msk [vmem:[#allocation2 + $0x38] sm:$0xf] %vm297_vm14, %v673_v20 }
  0xe3   : > { %v240_v38 = vpop.permute.xlu1 %239  ;;  %v320_v39 = vpop.permute.xlu0 %319 }
  0xe4   : > { %v242_v40 = vsel %vm241_vm15, %v238_v24, %v240_v38  ;;  %247 = vst.msk [vmem:[#allocation2 + $0x18] sm:$0xf0] %vm246_vm0, %v240_v38  ;;  %v338_v49 = vld [vmem:[#allocation2 + $0x30] sm:$0xff] }
  0xe5   : > { %245 = vst [vmem:[#allocation2 + $0x10] sm:$0xf0] %v242_v40  ;;  %v339_v48 = vld [vmem:[#allocation2 + $0x38] sm:$0xff] }
  0xe6   : > { %249 = vst.msk [vmem:[#allocation2 + $0x18] sm:$0xf0] %vm248_vm1, %v673_v20 }
  0xeb   : > { %v322_v41 = vpop.permute.xlu0 %321  ;;  %v345_v57 = vpop.permute.xlu1 %344 }
  0xec   : > { %v324_v42 = vsel %vm323_vm2, %v320_v39, %v322_v41  ;;  %329 = vst.msk [vmem:[#allocation2 + $0x48] sm:$0xf] %vm328_vm3, %v322_v41  ;;  %v334_v53 = vld [vmem:[#allocation2 + $0x10] sm:$0xff] }
  0xed   : > { %327 = vst [vmem:[#allocation2 + $0x40] sm:$0xf] %v324_v42  ;;  %v335_v52 = vld [vmem:[#allocation2 + $0x18] sm:$0xff] }
  0xee   : > { %331 = vst.msk [vmem:[#allocation2 + $0x48] sm:$0xf] %vm330_vm4, %v673_v20 }
  0xf3   : > { %v207_v44 = vpop.permute.xlu0 %206 }
  0xf4   : > { %v209_v45 = vsel %vm208_vm5, %v205_v43, %v207_v44  ;;  %214 = vst.msk [vmem:[#allocation2 + $0x8] sm:$0xf0] %vm213_vm6, %v207_v44  ;;  %v340_v46 = vld [vmem:[#allocation2 + $0x40] sm:$0xf] }
  0xf5   : > { %212 = vst [vmem:[#allocation2] sm:$0xf0] %v209_v45  ;;  %498 = vmatpush.msk.msra.mxu0 %vm351_vm7, %v340_v46  ;;  %v341_v47 = vld [vmem:[#allocation2 + $0x48] sm:$0xf] }
  0xf6   : > { %216 = vst.msk [vmem:[#allocation2 + $0x8] sm:$0xf0] %vm215_vm8, %v673_v20  ;;  %500 = vmatpush.msk.msra.mxu1 %vm351_vm7, %v341_v47 }
  0xf7   : > { %370 = vmatpush.msra.mxu0 %v338_v49 }
  0xf8   : > { %390 = vmatpush.msra.mxu1 %v339_v48 }
  0xf9   : > { %371 = vmatpush.msra.mxu0 %v336_v51 }
  0xfa   : > { %391 = vmatpush.msra.mxu1 %v337_v50 }
  0xfb   : > { %372 = vmatpush.msra.mxu0 %v334_v53 }
  0xfc   : > { %392 = vmatpush.msra.mxu1 %v335_v52  ;;  %v332_v55 = vld [vmem:[#allocation2] sm:$0xff] }
  0xfd   : > { %373 = vmatpush.msra.mxu0 %v332_v55  ;;  %v333_v56 = vld [vmem:[#allocation2 + $0x8] sm:$0xff] }
  0xfe   : > { %393 = vmatpush.msra.mxu1 %v333_v56  ;;  %499 = vmatmul.msk.f32.vlgmr.msra.gmra.mxu0 %vm347_vm9, %v189_v54 }
  0xff   : > { %501 = vmatmul.msk.f32.vlgmr.msra.gmra.mxu1 %vm347_vm9, %v189_v54 }
 0x17b   : > { %v375_v58 = vpop.f32.mrf.mxu0 }
 0x17c   : > { %v376_v59 = vadd.f32 %v375_v58, %v345_v57  ;;  %v395_v60 = vpop.f32.mrf.mxu1 }
 0x17d   : > { %v396_v61 = vadd.f32 %v395_v60, %v345_v57 }
 0x17e   : > { %v398_v62 = vmax.f32 %v376_v59, 0.0 }
 0x17f   : > { %v399_v63 = vmax.f32 %v396_v61, 0.0 }
 0x180   : > { %400 = vst [vmem:[%s188_s4] sm:$0xff] %v398_v62 }
 0x181   : > { %401 = vst [vmem:[%s188_s4 + $0x8] sm:$0xff] %v399_v63 }
 0x182   : > { %624 = shalt.err (!%p621_p4)
}
 0x183   : > { %511 = dma.vmem_to_hbm [thread:$0]  (%p745_p11), %s417_s23, 256, %s419_s5, %s403_s16  }
 0x184 PF: > { %s430_s26 = sand.u32 1, %s651_s12   ;;  %p846_p7 = scmp.ge.s32.totalorder %s663_s15, 2 }
 0x185   : > { %s431_s19 = scalar_lea.sflag [#allocation5], %s430_s26 }
 0x186   : > { %p518_p5 = pnand %p846_p7, %p749_p12 }
 0x188   : > { %p519_p8 = pneg %p518_p5 }
 0x18a   : > { %646 = dma.done.wait (%p519_p8), %s431_s19, 256  }
 0x18b   : > { %648 = vsyncadd (%p519_p8), %s431_s19, 4294967040  ;;  %p16_p10 = scmp.ge.s32.totalorder %s720_s18, 4   ;;  %s847_s12 = smov %s655_s13 }
 0x18c   : > { %s848_s13 = smov %s659_s14  ;;  %s849_s14 = smov %s732_s21 }
 0x18d   : > { %s850_s15 = smov %s720_s18  ;;  %18 = sbr.rel (!%p16_p10) target bundleno = 5 (0x5), region = 81 }
 0x192   :  { %437 = vsyncpa [#allocation4], 1 }
 0x193   :  { %439 = vsyncpa [#allocation4 + $0x1], 1 }
 0x194   :  { %440 = vsyncpa [#allocation5], 1 }
 0x195   :  { %442 = vsyncpa [#allocation5 + $0x1], 1 }

</bundles_post_ra>
